<compile_context>
chip_gen: v7x
topology: tpu7x:2x2x1
jax: 0.10.0
libtpu: 0.0.40
codegen_flags: <defaults>
</compile_context>

<pallas_src>
import functools

import jax
import jax.numpy as jnp
from jax import lax
from jax.experimental import pallas as pl
from jax.experimental.pallas import tpu as pltpu

_LANE = 128


def _round_up(x, m):
    return (x + m - 1) // m * m


def _sublane_multiple(dtype):
    size = jnp.dtype(dtype).itemsize
    if size >= 4:
        return 8
    if size == 2:
        return 16
    return 32


def _accumulate(labels_ref, logits_ref, acc_p_ref, acc_l_ref, acc_lp_ref,
                *, groups, unroll, mask_limit=None):
    """Accumulate sum(p), sum(l), sum(l*p) over `groups` lane groups of 128
    columns into the lane-wise (tile_b, 128) accumulators.

    Hot loop = VPU adds + EUP sigmoid only (no per-step XLU reduce); vreg
    pressure is bounded by the fori_loop unroll factor instead of a full
    Python unroll.  If `mask_limit` is given (static int), columns >= limit
    are masked out of all three sums (partial last tile).
    """
    tile_b = acc_p_ref.shape[0]
    if mask_limit is not None:
        iota = lax.broadcasted_iota(jnp.int32, (tile_b, _LANE), 1)  # hoisted

    def body(g, carry):
        acc_p, acc_l, acc_lp = carry
        start = pl.multiple_of(g * _LANE, _LANE)
        l_g = labels_ref[:, pl.ds(start, _LANE)].astype(jnp.float32)
        x_g = logits_ref[:, pl.ds(start, _LANE)].astype(jnp.float32)
        p_g = jax.nn.sigmoid(x_g)
        if mask_limit is not None:
            valid = iota < (mask_limit - start)
            # Mask ALL three sums so padding garbage (possibly NaN bit
            # patterns) cannot leak into the accumulators.
            p_g = jnp.where(valid, p_g, 0.0)
            l_g = jnp.where(valid, l_g, 0.0)
        return acc_p + p_g, acc_l + l_g, acc_lp + l_g * p_g

    init = (acc_p_ref[...], acc_l_ref[...], acc_lp_ref[...])
    acc_p, acc_l, acc_lp = lax.fori_loop(
        0, groups, body, init, unroll=max(1, min(unroll, groups)))
    acc_p_ref[...] = acc_p
    acc_l_ref[...] = acc_l
    acc_lp_ref[...] = acc_lp


def _f_sigmoid_kernel(labels_ref, logits_ref, prec_ref, rec_ref,
                      acc_p_ref, acc_l_ref, acc_lp_ref,
                      *, eps, groups_full, groups_last, last_limit, unroll):
    k = pl.program_id(1)                  # reduction step along N
    num_k = pl.num_programs(1)

    # Init per-row lane-wise accumulators on the first reduction step.
    @pl.when(k == 0)
    def _():
        acc_p_ref[...] = jnp.zeros_like(acc_p_ref)
        acc_l_ref[...] = jnp.zeros_like(acc_l_ref)
        acc_lp_ref[...] = jnp.zeros_like(acc_lp_ref)

    acc_refs = (acc_p_ref, acc_l_ref, acc_lp_ref)

    uniform = (groups_last == groups_full) and (last_limit is None)
    if uniform:
        # N divides tile_n: every step is a full, unmasked tile.
        _accumulate(labels_ref, logits_ref, *acc_refs,
                    groups=groups_full, unroll=unroll)
    else:
        # Full tiles for all but the last step; mask / shorten only the last.
        @pl.when(k != num_k - 1)
        def _():
            _accumulate(labels_ref, logits_ref, *acc_refs,
                        groups=groups_full, unroll=unroll)

        @pl.when(k == num_k - 1)
        def _():
            _accumulate(labels_ref, logits_ref, *acc_refs,
                        groups=groups_last, unroll=unroll,
                        mask_limit=last_limit)

    # Finalize: single cross-lane (XLU) reduce per quantity, per B-block.
    @pl.when(k == num_k - 1)
    def _():
        sum_p = jnp.sum(acc_p_ref[...], axis=1, keepdims=True)   # (tile_b, 1)
        sum_l = jnp.sum(acc_l_ref[...], axis=1, keepdims=True)
        tp = jnp.sum(acc_lp_ref[...], axis=1, keepdims=True)
        prec_ref[...] = tp / (sum_p + eps)
        rec_ref[...] = tp / (sum_l + eps)


def differenciable_f_sigmoid(labels, logits, *, eps=1e-6, beta=1.0, mean=False,
                             tile_b=None, tile_n=None, vmem_limit_bytes=None,
                             unroll=4, bf16_logits=False):
    """Pallas TPU forward pass of the PyTorch `differenciable_f_sigmoid`.

    labels, logits: (B, N).  Dtypes are kept as-is across the pallas_call
    boundary (bf16 logits / int8 labels are fine; the kernel is HBM-bound, so
    narrow inputs are the biggest lever) and upcast to f32 in-kernel.
    Returns (1 - loss, precise, recall) if mean=False, else 1 - loss.
    """
    labels = jnp.asarray(labels)
    logits = jnp.asarray(logits)
    if labels.dtype == jnp.bool_:
        labels = labels.astype(jnp.int8)       # 0/1 labels: 1 byte over HBM
    if bf16_logits:
        # Opt-in: halves logits HBM traffic; changes sigmoid input precision.
        logits = logits.astype(jnp.bfloat16)
    B, N = logits.shape
    assert labels.shape == (B, N)

    sub = max(_sublane_multiple(labels.dtype), _sublane_multiple(logits.dtype))

    if vmem_limit_bytes is None:
        # Generation-aware scoped VMEM: ~half of per-core capacity
        # (≈64 MiB on v5e/v6e's 128 MiB, ≈32 MiB on v7x's 64 MiB), leaving
        # headroom for Mosaic internal scratch.
        try:
            cap = int(pltpu.get_tpu_info().vmem_capacity_bytes)
        except Exception:  # conservative fallback if the query is unavailable
            cap = 64 * 1024 * 1024
        vmem_limit_bytes = min(cap // 2, 96 * 1024 * 1024)

    if tile_b is None:
        if B <= sub:
            tile_b = B                     # full-dim block: always legal
        else:
            # <=32 rows keeps the three f32 accumulators register-friendly;
            # aim for >=2 blocks on the "parallel" B axis (v7x: 2 TCs);
            # keep the block sublane-aligned for the input dtypes.
            tile_b = min(32, max(sub, _round_up(pl.cdiv(B, 2), sub)))
    tile_b = min(tile_b, B)

    if tile_n is None:
        # Pipeline VMEM ≈ 2 inputs × 2 buffers × tile_b × tile_n × itemsize;
        # size the N tile from ~70% of the scoped VMEM limit (no hard cap —
        # fewer, larger DMA blocks amortize the ~0.35us per-step overhead).
        bytes_per_col = 2 * tile_b * (labels.dtype.itemsize
                                      + logits.dtype.itemsize)
        budget = int(vmem_limit_bytes * 0.7)
        tile_n = max(_LANE, (budget // bytes_per_col) // _LANE * _LANE)
        tile_n = min(tile_n, _round_up(N, _LANE))
    assert tile_n % _LANE == 0

    grid_b = pl.cdiv(B, tile_b)
    grid_k = pl.cdiv(N, tile_n)

    rem = N - (grid_k - 1) * tile_n          # valid columns in the last tile
    groups_full = tile_n // _LANE
    groups_last = pl.cdiv(rem, _LANE)
    last_limit = None if rem % _LANE == 0 else rem

    kernel = functools.partial(
        _f_sigmoid_kernel, eps=float(eps),
        groups_full=groups_full, groups_last=groups_last,
        last_limit=last_limit, unroll=max(1, int(unroll)))

    out_shapes = (
        jax.ShapeDtypeStruct((B, 1), jnp.float32),   # precise
        jax.ShapeDtypeStruct((B, 1), jnp.float32),   # recall
    )

    grid_spec = pltpu.PrefetchScalarGridSpec(
        num_scalar_prefetch=0,
        grid=(grid_b, grid_k),                       # reduction axis last
        in_specs=[
            pl.BlockSpec((tile_b, tile_n), lambda bi, ki: (bi, ki)),  # labels
            pl.BlockSpec((tile_b, tile_n), lambda bi, ki: (bi, ki)),  # logits
        ],
        out_specs=[
            pl.BlockSpec((tile_b, 1), lambda bi, ki: (bi, 0)),
            pl.BlockSpec((tile_b, 1), lambda bi, ki: (bi, 0)),
        ],
        scratch_shapes=[
            pltpu.VMEM((tile_b, _LANE), jnp.float32),   # running sum(p)
            pltpu.VMEM((tile_b, _LANE), jnp.float32),   # running sum(l)
            pltpu.VMEM((tile_b, _LANE), jnp.float32),   # running sum(l*p)
        ],
    )

    precise, recall = pl.pallas_call(
        kernel,
        out_shape=out_shapes,
        grid_spec=grid_spec,
        compiler_params=pltpu.CompilerParams(
            dimension_semantics=("parallel", "arbitrary"),
            vmem_limit_bytes=vmem_limit_bytes),
    )(labels, logits)

    precise = precise[:, 0]
    recall = recall[:, 0]

    # Tiny (B,)-sized epilogue in plain JAX: fs, loss = sum(fs)/B, 1 - loss.
    beta2 = float(beta) * float(beta)
    fs = (1.0 + beta2) * precise * recall / (beta2 * precise + recall + eps)
    one_minus_loss = 1.0 - jnp.sum(fs) / B
    if mean:
        return one_minus_loss
    return one_minus_loss, precise, recall


def _reference(labels, logits, eps=1e-6, beta=1.0):
    p = jax.nn.sigmoid(logits)
    l = labels
    num_pos = jnp.sum(p, 1) + eps
    num_pos_hat = jnp.sum(l, 1) + eps
    tp = jnp.sum(l * p, 1)
    precise = tp / num_pos
    recall = tp / num_pos_hat
    fs = (1 + beta * beta) * precise * recall / (beta * beta * precise + recall + eps)
    loss = fs.sum() / logits.shape[0]
    return 1 - loss, precise, recall


if __name__ == "__main__":
    key = jax.random.PRNGKey(0)
    k1, k2, k3, k4 = jax.random.split(key, 4)

    # Case 1: N not a multiple of 128 -> masked tail; single B block.
    B, N = 8, 300
    logits = jax.random.normal(k1, (B, N), dtype=jnp.float32)
    labels = (jax.random.uniform(k2, (B, N)) > 0.5).astype(jnp.float32)

    out = differenciable_f_sigmoid(labels, logits, eps=1e-6, beta=1.0, mean=False)
    out = jax.block_until_ready(out)
    ref = _reference(labels, logits)
    for a, b in zip(out, ref):
        assert jnp.allclose(a, b, atol=1e-5, rtol=1e-5), (a, b)

    # mean=True path
    lm = differenciable_f_sigmoid(labels, logits, eps=1e-6, beta=1.0, mean=True)
    lm = jax.block_until_ready(lm)
    assert jnp.allclose(lm, ref[0], atol=1e-5, rtol=1e-5), (lm, ref[0])

    # Case 2: B not a multiple of tile_b (padded rows in the last B block,
    # multiple "parallel" B blocks) + masked N tail.
    B2, N2 = 20, 1000
    logits2 = jax.random.normal(k3, (B2, N2), dtype=jnp.float32)
    labels2 = (jax.random.uniform(k4, (B2, N2)) > 0.5).astype(jnp.float32)
    out2 = differenciable_f_sigmoid(labels2, logits2, mean=False)
    out2 = jax.block_until_ready(out2)
    ref2 = _reference(labels2, logits2)
    for a, b in zip(out2, ref2):
        assert jnp.allclose(a, b, atol=1e-5, rtol=1e-5), (a, b)

    print("KERNEL_OK")
</pallas_src>

<mosaic_0001>
module attributes {stable_mosaic.version = 11 : i64} {
  func.func @_f_sigmoid_kernel(%arg0: i32, %arg1: i32, %arg2: memref<8x384xf32, #tpu.memory_space<vmem>>, %arg3: memref<8x384xf32, #tpu.memory_space<vmem>>, %arg4: memref<8x1xf32, #tpu.memory_space<vmem>>, %arg5: memref<8x1xf32, #tpu.memory_space<vmem>>, %arg6: memref<8x128xf32, #tpu.memory_space<vmem>>, %arg7: memref<8x128xf32, #tpu.memory_space<vmem>>, %arg8: memref<8x128xf32, #tpu.memory_space<vmem>>) attributes {dimension_semantics = [#tpu.dimension_semantics<parallel>, #tpu.dimension_semantics<arbitrary>], iteration_bounds = array<i64: 1, 1>, scalar_prefetch = 0 : i64, scratch_operands = 3 : i64, tpu.core_type = #tpu.core_type<tc>, window_params = [{transform_indices = @transform_0, window_bounds = array<i64: 8, 384>}, {transform_indices = @transform_1, window_bounds = array<i64: 8, 384>}, {transform_indices = @transform_2, window_bounds = array<i64: 8, 1>}, {transform_indices = @transform_3, window_bounds = array<i64: 8, 1>}]} {
    %c0_i32 = arith.constant 0 : i32
    %0 = arith.cmpi eq, %arg1, %c0_i32 : i32
    %1 = arith.extui %0 : i1 to i32
    %c0_i32_0 = arith.constant 0 : i32
    %2 = arith.cmpi ne, %1, %c0_i32_0 : i32
    scf.if %2 {
      %cst = arith.constant 0.000000e+00 : f32
      %12 = vector.broadcast %cst : f32 to vector<8x128xf32>
      %c0 = arith.constant 0 : index
      %c0_7 = arith.constant 0 : index
      %13 = vector.load %arg6[%c0, %c0_7] : memref<8x128xf32, #tpu.memory_space<vmem>>, vector<8x128xf32>
      tpu.vector_store %arg6[%c0, %c0_7], %12 {strides = array<i32>} : memref<8x128xf32, #tpu.memory_space<vmem>>, vector<8x128xf32>,
      %cst_8 = arith.constant 0.000000e+00 : f32
      %14 = vector.broadcast %cst_8 : f32 to vector<8x128xf32>
      %c0_9 = arith.constant 0 : index
      %c0_10 = arith.constant 0 : index
      %15 = vector.load %arg7[%c0_9, %c0_10] : memref<8x128xf32, #tpu.memory_space<vmem>>, vector<8x128xf32>
      tpu.vector_store %arg7[%c0_9, %c0_10], %14 {strides = array<i32>} : memref<8x128xf32, #tpu.memory_space<vmem>>, vector<8x128xf32>,
      %cst_11 = arith.constant 0.000000e+00 : f32
      %16 = vector.broadcast %cst_11 : f32 to vector<8x128xf32>
      %c0_12 = arith.constant 0 : index
      %c0_13 = arith.constant 0 : index
      %17 = vector.load %arg8[%c0_12, %c0_13] : memref<8x128xf32, #tpu.memory_space<vmem>>, vector<8x128xf32>
      tpu.vector_store %arg8[%c0_12, %c0_13], %16 {strides = array<i32>} : memref<8x128xf32, #tpu.memory_space<vmem>>, vector<8x128xf32>,
    } else {
    }
    %c0_i32_1 = arith.constant 0 : i32
    %3 = arith.cmpi ne, %arg1, %c0_i32_1 : i32
    %4 = arith.extui %3 : i1 to i32
    %c0_i32_2 = arith.constant 0 : i32
    %5 = arith.cmpi ne, %4, %c0_i32_2 : i32
    scf.if %5 {
      %c0 = arith.constant 0 : index
      %c0_7 = arith.constant 0 : index
      %12 = vector.load %arg6[%c0, %c0_7] : memref<8x128xf32, #tpu.memory_space<vmem>>, vector<8x128xf32>
      %c0_8 = arith.constant 0 : index
      %c0_9 = arith.constant 0 : index
      %13 = vector.load %arg7[%c0_8, %c0_9] : memref<8x128xf32, #tpu.memory_space<vmem>>, vector<8x128xf32>
      %c0_10 = arith.constant 0 : index
      %c0_11 = arith.constant 0 : index
      %14 = vector.load %arg8[%c0_10, %c0_11] : memref<8x128xf32, #tpu.memory_space<vmem>>, vector<8x128xf32>
      %c0_i32_12 = arith.constant 0 : i32
      %c128_i32 = arith.constant 128 : i32
      %15 = arith.muli %c0_i32_12, %c128_i32 : i32
      %16 = tpu.assume_multiple %15, 128 : i32
      %c0_13 = arith.constant 0 : index
      %17 = arith.index_cast %16 : i32 to index
      %18 = vector.load %arg2[%c0_13, %17] : memref<8x384xf32, #tpu.memory_space<vmem>>, vector<8x128xf32>
      %c0_14 = arith.constant 0 : index
      %19 = arith.index_cast %16 : i32 to index
      %20 = vector.load %arg3[%c0_14, %19] : memref<8x384xf32, #tpu.memory_space<vmem>>, vector<8x128xf32>
      %21 = arith.negf %20 : vector<8x128xf32>
      %22 = math.exp %21 : vector<8x128xf32>
      %cst = arith.constant 1.000000e+00 : f32
      %23 = vector.broadcast %cst : f32 to vector<8x128xf32>
      %24 = arith.addf %23, %22 : vector<8x128xf32>
      %25 = arith.divf %23, %24 : vector<8x128xf32>
      %26 = arith.addf %12, %25 : vector<8x128xf32>
      %27 = arith.addf %13, %18 : vector<8x128xf32>
      %28 = arith.mulf %18, %25 : vector<8x128xf32>
      %29 = arith.addf %14, %28 : vector<8x128xf32>
      %c1_i32 = arith.constant 1 : i32
      %c128_i32_15 = arith.constant 128 : i32
      %30 = arith.muli %c1_i32, %c128_i32_15 : i32
      %31 = tpu.assume_multiple %30, 128 : i32
      %c0_16 = arith.constant 0 : index
      %32 = arith.index_cast %31 : i32 to index
      %33 = vector.load %arg2[%c0_16, %32] : memref<8x384xf32, #tpu.memory_space<vmem>>, vector<8x128xf32>
      %c0_17 = arith.constant 0 : index
      %34 = arith.index_cast %31 : i32 to index
      %35 = vector.load %arg3[%c0_17, %34] : memref<8x384xf32, #tpu.memory_space<vmem>>, vector<8x128xf32>
      %36 = arith.negf %35 : vector<8x128xf32>
      %37 = math.exp %36 : vector<8x128xf32>
      %cst_18 = arith.constant 1.000000e+00 : f32
      %38 = vector.broadcast %cst_18 : f32 to vector<8x128xf32>
      %39 = arith.addf %38, %37 : vector<8x128xf32>
      %40 = arith.divf %38, %39 : vector<8x128xf32>
      %41 = arith.addf %26, %40 : vector<8x128xf32>
      %42 = arith.addf %27, %33 : vector<8x128xf32>
      %43 = arith.mulf %33, %40 : vector<8x128xf32>
      %44 = arith.addf %29, %43 : vector<8x128xf32>
      %c2_i32 = arith.constant 2 : i32
      %c128_i32_19 = arith.constant 128 : i32
      %45 = arith.muli %c2_i32, %c128_i32_19 : i32
      %46 = tpu.assume_multiple %45, 128 : i32
      %c0_20 = arith.constant 0 : index
      %47 = arith.index_cast %46 : i32 to index
      %48 = vector.load %arg2[%c0_20, %47] : memref<8x384xf32, #tpu.memory_space<vmem>>, vector<8x128xf32>
      %c0_21 = arith.constant 0 : index
      %49 = arith.index_cast %46 : i32 to index
      %50 = vector.load %arg3[%c0_21, %49] : memref<8x384xf32, #tpu.memory_space<vmem>>, vector<8x128xf32>
      %51 = arith.negf %50 : vector<8x128xf32>
      %52 = math.exp %51 : vector<8x128xf32>
      %cst_22 = arith.constant 1.000000e+00 : f32
      %53 = vector.broadcast %cst_22 : f32 to vector<8x128xf32>
      %54 = arith.addf %53, %52 : vector<8x128xf32>
      %55 = arith.divf %53, %54 : vector<8x128xf32>
      %56 = arith.addf %41, %55 : vector<8x128xf32>
      %57 = arith.addf %42, %48 : vector<8x128xf32>
      %58 = arith.mulf %48, %55 : vector<8x128xf32>
      %59 = arith.addf %44, %58 : vector<8x128xf32>
      %c3_i32 = arith.constant 3 : i32
      %c0_23 = arith.constant 0 : index
      %c0_24 = arith.constant 0 : index
      %60 = vector.load %arg6[%c0_23, %c0_24] : memref<8x128xf32, #tpu.memory_space<vmem>>, vector<8x128xf32>
      tpu.vector_store %arg6[%c0_23, %c0_24], %56 {strides = array<i32>} : memref<8x128xf32, #tpu.memory_space<vmem>>, vector<8x128xf32>,
      %c0_25 = arith.constant 0 : index
      %c0_26 = arith.constant 0 : index
      %61 = vector.load %arg7[%c0_25, %c0_26] : memref<8x128xf32, #tpu.memory_space<vmem>>, vector<8x128xf32>
      tpu.vector_store %arg7[%c0_25, %c0_26], %57 {strides = array<i32>} : memref<8x128xf32, #tpu.memory_space<vmem>>, vector<8x128xf32>,
      %c0_27 = arith.constant 0 : index
      %c0_28 = arith.constant 0 : index
      %62 = vector.load %arg8[%c0_27, %c0_28] : memref<8x128xf32, #tpu.memory_space<vmem>>, vector<8x128xf32>
      tpu.vector_store %arg8[%c0_27, %c0_28], %59 {strides = array<i32>} : memref<8x128xf32, #tpu.memory_space<vmem>>, vector<8x128xf32>,
    } else {
    }
    %c0_i32_3 = arith.constant 0 : i32
    %6 = arith.cmpi eq, %arg1, %c0_i32_3 : i32
    %7 = arith.extui %6 : i1 to i32
    %c0_i32_4 = arith.constant 0 : i32
    %8 = arith.cmpi ne, %7, %c0_i32_4 : i32
    scf.if %8 {
      %12 = tpu.iota {dimensions = array<i32: 1>} : vector<8x128xi32>
      %c0 = arith.constant 0 : index
      %c0_7 = arith.constant 0 : index
      %13 = vector.load %arg6[%c0, %c0_7] : memref<8x128xf32, #tpu.memory_space<vmem>>, vector<8x128xf32>
      %c0_8 = arith.constant 0 : index
      %c0_9 = arith.constant 0 : index
      %14 = vector.load %arg7[%c0_8, %c0_9] : memref<8x128xf32, #tpu.memory_space<vmem>>, vector<8x128xf32>
      %c0_10 = arith.constant 0 : index
      %c0_11 = arith.constant 0 : index
      %15 = vector.load %arg8[%c0_10, %c0_11] : memref<8x128xf32, #tpu.memory_space<vmem>>, vector<8x128xf32>
      %c0_i32_12 = arith.constant 0 : i32
      %c128_i32 = arith.constant 128 : i32
      %16 = arith.muli %c0_i32_12, %c128_i32 : i32
      %17 = tpu.assume_multiple %16, 128 : i32
      %c0_13 = arith.constant 0 : index
      %18 = arith.index_cast %17 : i32 to index
      %19 = vector.load %arg2[%c0_13, %18] : memref<8x384xf32, #tpu.memory_space<vmem>>, vector<8x128xf32>
      %c0_14 = arith.constant 0 : index
      %20 = arith.index_cast %17 : i32 to index
      %21 = vector.load %arg3[%c0_14, %20] : memref<8x384xf32, #tpu.memory_space<vmem>>, vector<8x128xf32>
      %22 = arith.negf %21 : vector<8x128xf32>
      %23 = math.exp %22 : vector<8x128xf32>
      %cst = arith.constant 1.000000e+00 : f32
      %24 = vector.broadcast %cst : f32 to vector<8x128xf32>
      %25 = arith.addf %24, %23 : vector<8x128xf32>
      %26 = arith.divf %24, %25 : vector<8x128xf32>
      %c300_i32 = arith.constant 300 : i32
      %27 = arith.subi %c300_i32, %17 : i32
      %28 = vector.broadcast %27 : i32 to vector<8x128xi32>
      %29 = arith.cmpi slt, %12, %28 : vector<8x128xi32>
      %cst_15 = arith.constant 0.000000e+00 : f32
      %30 = vector.broadcast %cst_15 : f32 to vector<8x128xf32>
      %31 = arith.select %29, %26, %30 : vector<8x128xi1>, vector<8x128xf32>
      %cst_16 = arith.constant 0.000000e+00 : f32
      %32 = vector.broadcast %cst_16 : f32 to vector<8x128xf32>
      %33 = arith.select %29, %19, %32 : vector<8x128xi1>, vector<8x128xf32>
      %34 = arith.addf %13, %31 : vector<8x128xf32>
      %35 = arith.addf %14, %33 : vector<8x128xf32>
      %36 = arith.mulf %33, %31 : vector<8x128xf32>
      %37 = arith.addf %15, %36 : vector<8x128xf32>
      %c1_i32 = arith.constant 1 : i32
      %c128_i32_17 = arith.constant 128 : i32
      %38 = arith.muli %c1_i32, %c128_i32_17 : i32
      %39 = tpu.assume_multiple %38, 128 : i32
      %c0_18 = arith.constant 0 : index
      %40 = arith.index_cast %39 : i32 to index
      %41 = vector.load %arg2[%c0_18, %40] : memref<8x384xf32, #tpu.memory_space<vmem>>, vector<8x128xf32>
      %c0_19 = arith.constant 0 : index
      %42 = arith.index_cast %39 : i32 to index
      %43 = vector.load %arg3[%c0_19, %42] : memref<8x384xf32, #tpu.memory_space<vmem>>, vector<8x128xf32>
      %44 = arith.negf %43 : vector<8x128xf32>
      %45 = math.exp %44 : vector<8x128xf32>
      %cst_20 = arith.constant 1.000000e+00 : f32
      %46 = vector.broadcast %cst_20 : f32 to vector<8x128xf32>
      %47 = arith.addf %46, %45 : vector<8x128xf32>
      %48 = arith.divf %46, %47 : vector<8x128xf32>
      %c300_i32_21 = arith.constant 300 : i32
      %49 = arith.subi %c300_i32_21, %39 : i32
      %50 = vector.broadcast %49 : i32 to vector<8x128xi32>
      %51 = arith.cmpi slt, %12, %50 : vector<8x128xi32>
      %cst_22 = arith.constant 0.000000e+00 : f32
      %52 = vector.broadcast %cst_22 : f32 to vector<8x128xf32>
      %53 = arith.select %51, %48, %52 : vector<8x128xi1>, vector<8x128xf32>
      %cst_23 = arith.constant 0.000000e+00 : f32
      %54 = vector.broadcast %cst_23 : f32 to vector<8x128xf32>
      %55 = arith.select %51, %41, %54 : vector<8x128xi1>, vector<8x128xf32>
      %56 = arith.addf %34, %53 : vector<8x128xf32>
      %57 = arith.addf %35, %55 : vector<8x128xf32>
      %58 = arith.mulf %55, %53 : vector<8x128xf32>
      %59 = arith.addf %37, %58 : vector<8x128xf32>
      %c2_i32 = arith.constant 2 : i32
      %c128_i32_24 = arith.constant 128 : i32
      %60 = arith.muli %c2_i32, %c128_i32_24 : i32
      %61 = tpu.assume_multiple %60, 128 : i32
      %c0_25 = arith.constant 0 : index
      %62 = arith.index_cast %61 : i32 to index
      %63 = vector.load %arg2[%c0_25, %62] : memref<8x384xf32, #tpu.memory_space<vmem>>, vector<8x128xf32>
      %c0_26 = arith.constant 0 : index
      %64 = arith.index_cast %61 : i32 to index
      %65 = vector.load %arg3[%c0_26, %64] : memref<8x384xf32, #tpu.memory_space<vmem>>, vector<8x128xf32>
      %66 = arith.negf %65 : vector<8x128xf32>
      %67 = math.exp %66 : vector<8x128xf32>
      %cst_27 = arith.constant 1.000000e+00 : f32
      %68 = vector.broadcast %cst_27 : f32 to vector<8x128xf32>
      %69 = arith.addf %68, %67 : vector<8x128xf32>
      %70 = arith.divf %68, %69 : vector<8x128xf32>
      %c300_i32_28 = arith.constant 300 : i32
      %71 = arith.subi %c300_i32_28, %61 : i32
      %72 = vector.broadcast %71 : i32 to vector<8x128xi32>
      %73 = arith.cmpi slt, %12, %72 : vector<8x128xi32>
      %cst_29 = arith.constant 0.000000e+00 : f32
      %74 = vector.broadcast %cst_29 : f32 to vector<8x128xf32>
      %75 = arith.select %73, %70, %74 : vector<8x128xi1>, vector<8x128xf32>
      %cst_30 = arith.constant 0.000000e+00 : f32
      %76 = vector.broadcast %cst_30 : f32 to vector<8x128xf32>
      %77 = arith.select %73, %63, %76 : vector<8x128xi1>, vector<8x128xf32>
      %78 = arith.addf %56, %75 : vector<8x128xf32>
      %79 = arith.addf %57, %77 : vector<8x128xf32>
      %80 = arith.mulf %77, %75 : vector<8x128xf32>
      %81 = arith.addf %59, %80 : vector<8x128xf32>
      %c3_i32 = arith.constant 3 : i32
      %c0_31 = arith.constant 0 : index
      %c0_32 = arith.constant 0 : index
      %82 = vector.load %arg6[%c0_31, %c0_32] : memref<8x128xf32, #tpu.memory_space<vmem>>, vector<8x128xf32>
      tpu.vector_store %arg6[%c0_31, %c0_32], %78 {strides = array<i32>} : memref<8x128xf32, #tpu.memory_space<vmem>>, vector<8x128xf32>,
      %c0_33 = arith.constant 0 : index
      %c0_34 = arith.constant 0 : index
      %83 = vector.load %arg7[%c0_33, %c0_34] : memref<8x128xf32, #tpu.memory_space<vmem>>, vector<8x128xf32>
      tpu.vector_store %arg7[%c0_33, %c0_34], %79 {strides = array<i32>} : memref<8x128xf32, #tpu.memory_space<vmem>>, vector<8x128xf32>,
      %c0_35 = arith.constant 0 : index
      %c0_36 = arith.constant 0 : index
      %84 = vector.load %arg8[%c0_35, %c0_36] : memref<8x128xf32, #tpu.memory_space<vmem>>, vector<8x128xf32>
      tpu.vector_store %arg8[%c0_35, %c0_36], %81 {strides = array<i32>} : memref<8x128xf32, #tpu.memory_space<vmem>>, vector<8x128xf32>,
    } else {
    }
    %c0_i32_5 = arith.constant 0 : i32
    %9 = arith.cmpi eq, %arg1, %c0_i32_5 : i32
    %10 = arith.extui %9 : i1 to i32
    %c0_i32_6 = arith.constant 0 : i32
    %11 = arith.cmpi ne, %10, %c0_i32_6 : i32
    scf.if %11 {
      %c0 = arith.constant 0 : index
      %c0_7 = arith.constant 0 : index
      %12 = vector.load %arg6[%c0, %c0_7] : memref<8x128xf32, #tpu.memory_space<vmem>>, vector<8x128xf32>
      %cst = arith.constant dense<0.000000e+00> : vector<8xf32>
      %13 = vector.multi_reduction <add>, %12, %cst [1] : vector<8x128xf32> to vector<8xf32>
      %14 = vector.shape_cast %13 : vector<8xf32> to vector<8x1xf32>
      %c0_8 = arith.constant 0 : index
      %c0_9 = arith.constant 0 : index
      %15 = vector.load %arg7[%c0_8, %c0_9] : memref<8x128xf32, #tpu.memory_space<vmem>>, vector<8x128xf32>
      %cst_10 = arith.constant dense<0.000000e+00> : vector<8xf32>
      %16 = vector.multi_reduction <add>, %15, %cst_10 [1] : vector<8x128xf32> to vector<8xf32>
      %17 = vector.shape_cast %16 : vector<8xf32> to vector<8x1xf32>
      %c0_11 = arith.constant 0 : index
      %c0_12 = arith.constant 0 : index
      %18 = vector.load %arg8[%c0_11, %c0_12] : memref<8x128xf32, #tpu.memory_space<vmem>>, vector<8x128xf32>
      %cst_13 = arith.constant dense<0.000000e+00> : vector<8xf32>
      %19 = vector.multi_reduction <add>, %18, %cst_13 [1] : vector<8x128xf32> to vector<8xf32>
      %20 = vector.shape_cast %19 : vector<8xf32> to vector<8x1xf32>
      %cst_14 = arith.constant 9.99999997E-7 : f32
      %21 = vector.broadcast %cst_14 : f32 to vector<8x1xf32>
      %22 = arith.addf %14, %21 : vector<8x1xf32>
      %23 = arith.divf %20, %22 : vector<8x1xf32>
      %c0_15 = arith.constant 0 : index
      %c0_16 = arith.constant 0 : index
      %24 = vector.load %arg4[%c0_15, %c0_16] : memref<8x1xf32, #tpu.memory_space<vmem>>, vector<8x1xf32>
      tpu.vector_store %arg4[%c0_15, %c0_16], %23 {strides = array<i32>} : memref<8x1xf32, #tpu.memory_space<vmem>>, vector<8x1xf32>,
      %cst_17 = arith.constant 9.99999997E-7 : f32
      %25 = vector.broadcast %cst_17 : f32 to vector<8x1xf32>
      %26 = arith.addf %17, %25 : vector<8x1xf32>
      %27 = arith.divf %20, %26 : vector<8x1xf32>
      %c0_18 = arith.constant 0 : index
      %c0_19 = arith.constant 0 : index
      %28 = vector.load %arg5[%c0_18, %c0_19] : memref<8x1xf32, #tpu.memory_space<vmem>>, vector<8x1xf32>
      tpu.vector_store %arg5[%c0_18, %c0_19], %27 {strides = array<i32>} : memref<8x1xf32, #tpu.memory_space<vmem>>, vector<8x1xf32>,
    } else {
    }
    return
  }
  func.func @transform_0(%arg0: i32, %arg1: i32) -> (i32, i32) {
    %c0_i32 = arith.constant 0 : i32
    return %arg0, %arg1 : i32, i32
  }
  func.func @transform_1(%arg0: i32, %arg1: i32) -> (i32, i32) {
    %c0_i32 = arith.constant 0 : i32
    return %arg0, %arg1 : i32, i32
  }
  func.func @transform_2(%arg0: i32, %arg1: i32) -> (i32, i32) {
    %c0_i32 = arith.constant 0 : i32
    %c0_i32_0 = arith.constant 0 : i32
    return %arg0, %c0_i32 : i32, i32
  }
  func.func @transform_3(%arg0: i32, %arg1: i32) -> (i32, i32) {
    %c0_i32 = arith.constant 0 : i32
    %c0_i32_0 = arith.constant 0 : i32
    return %arg0, %c0_i32 : i32, i32
  }
}

</mosaic_0001>

<bundles_post_ra>
// kernel: tpu_custom_call.1
= control target key start
LH: loop header
LB: loop body
LE: loop exit
PB: predicated region body
PF: predicated region fallthrough
CT: control target
= control target key end

     0   :  { %9 = vsyncpa [#allocation6], 0  ;;  %s312_s0 = inlined_call_operand.hbm [shape: f32[8,300], index: 0, kind: input, shape index: {}]   ;;  %s313_s1 = inlined_call_operand.hbm [shape: f32[8,300], index: 1, kind: input, shape index: {}]   ;;  %s314_s2 = inlined_call_operand.vmem [shape: f32[8,1], index: 2, kind: output, shape index: {0}]   ;;  %s315_s3 = inlined_call_operand.vmem [shape: f32[8,1], index: 3, kind: output, shape index: {1}]  }
   0x1   :  { %10 = vsyncpa [#allocation8], 0  ;;  %s260_s12 = smov [#allocation5]   ;;  %s261_s14 = smov [#allocation7]  }
   0x2   :  { %s17_s13 = sshll.u32 %s260_s12, 4  ;;  %s27_s15 = sshll.u32 %s261_s14, 4  ;;  %s18_s13 = int_to_ptr.vmem [resolvable:$true] %s17_s13  ;;  %s28_s15 = int_to_ptr.vmem [resolvable:$true] %s27_s15 }
   0x3   :  { %s212_s18 = scalar_lea.hbm %s312_s0, 384 }
   0x4   :  { %p213_p0 = scmp.ne.s32.totalorder %s312_s0, %s212_s18  ;;  %p216_p1 = scmp.lt.u32.totalorder %s212_s18, %s312_s0 }
   0x6   :  { %p218_p2 = pnand %p216_p1, %p213_p0 }
   0x8   :  { %221 = shalt.err (!%p218_p2)
}
   0x9   :  { %s222_s23 = scalar_lea.vmem %s18_s13, 384  ;;  %p227_p4 = scmp.lt.s32.totalorder %s18_s13, %s18_s13 }
   0xa   :  { %p223_p3 = scmp.ne.s32.totalorder %s18_s13, %s222_s23  ;;  %p228_p5 = scmp.lt.s32.totalorder %s222_s23, %s222_s23 }
   0xc   :  { %p229_p6 = por %p228_p5, %p227_p4 }
   0xe   :  { %p230_p7 = pnand %p229_p6, %p223_p3 }
  0x10   :  { %233 = shalt.err (!%p230_p7)
}
  0x11   :  { %20 = dma.hbm_to_vmem [thread:$0]  %s312_s0, 384, %s18_s13, [#allocation6]  }
  0x12   :  { %s234_s28 = scalar_lea.hbm %s313_s1, 384 }
  0x13   :  { %p235_p8 = scmp.ne.s32.totalorder %s313_s1, %s234_s28  ;;  %p238_p9 = scmp.lt.u32.totalorder %s234_s28, %s313_s1 }
  0x15   :  { %p240_p10 = pnand %p238_p9, %p235_p8 }
  0x17   :  { %243 = shalt.err (!%p240_p10)
}
  0x18   :  { %s244_s6 = scalar_lea.vmem %s28_s15, 384  ;;  %p249_p12 = scmp.lt.s32.totalorder %s28_s15, %s28_s15 }
  0x19   :  { %p245_p11 = scmp.ne.s32.totalorder %s28_s15, %s244_s6  ;;  %p250_p13 = scmp.lt.s32.totalorder %s244_s6, %s244_s6 }
  0x1b   :  { %p251_p0 = por %p250_p13, %p249_p12 }
  0x1d   :  { %p252_p1 = pnand %p251_p0, %p245_p11 }
  0x1f   :  { %255 = shalt.err (!%p252_p1)
}
  0x20   :  { %30 = dma.hbm_to_vmem [thread:$0]  %s313_s1, 384, %s28_s15, [#allocation8]  }
  0x21   :  { %256 = dma.done.wait [#allocation6], 384  }
  0x22   :  { %257 = vsyncadd [#allocation6], 4294966912 }
  0x23   :  { %258 = dma.done.wait [#allocation8], 384  }
  0x24   :  { %259 = vsyncadd [#allocation8], 4294966912  ;;  %v103_v0 = vld [vmem:[#allocation7] sm:$0xff]  ;;  %v122_v1 = vld [vmem:[#allocation7 + $0x8] sm:$0xff]  ;;  %v97_v12 = vlaneseq  ;;  %vm172_vm1 = vcmask 7168  }
  0x25   :  { %v141_v2 = vld [vmem:[#allocation7 + $0x10] sm:$0xff]  ;;  %v191_v3 = vmul.f32 -1.442695, %v103_v0  ;;  %v192_v4 = vmul.f32 -1.442695, %v122_v1  ;;  %v102_v14 = vld [vmem:[#allocation5] sm:$0xff] }
  0x26   :  { %v193_v5 = vmul.f32 -1.442695, %v141_v2  ;;  %v98_v13 = vand.u32 127, %v97_v12  ;;  %v120_v15 = vld [vmem:[#allocation5 + $0x8] sm:$0xff]  ;;  %v139_v17 = vld [vmem:[#allocation5 + $0x10] sm:$0xff] }
  0x27   :  { %196 = vpow2.f32 %v191_v3  ;;  %v135_v22 = vadd.f32 %v120_v15, %v102_v14 }
  0x28   :  { %198 = vpow2.f32 %v192_v4  ;;  %vm150_vm0 = vcmp.lt.s32.totalorder %v98_v13, 44 }
  0x29   :  { %200 = vpow2.f32 %v193_v5  ;;  %v152_v25 = vsel %vm150_vm0, %v139_v17, 0.0 }
  0x2a   :  { %v154_v29 = vadd.f32 %v152_v25, %v135_v22 }
  0x31   :  { %v197_v6 = vpop.eup %196 }
  0x32   :  { %v199_v7 = vpop.eup %198  ;;  %v107_v8 = vadd.f32 1.0, %v197_v6 }
  0x33   :  { %v201_v9 = vpop.eup %200  ;;  %v126_v10 = vadd.f32 1.0, %v199_v7 }
  0x34   :  { %202 = vrcp.f32 %v107_v8  ;;  %v145_v11 = vadd.f32 1.0, %v201_v9 }
  0x35   :  { %204 = vrcp.f32 %v126_v10 }
  0x36   :  { %206 = vrcp.f32 %v145_v11 }
  0x3e   :  { %v203_v16 = vpop.eup %202 }
  0x3f   :  { %v205_v18 = vpop.eup %204  ;;  %v117_v19 = vmul.f32 %v203_v16, %v102_v14 }
  0x40   :  { %v207_v20 = vpop.eup %206  ;;  %v134_v21 = vadd.f32 %v205_v18, %v203_v16  ;;  %v136_v23 = vmul.f32 %v205_v18, %v120_v15 }
  0x41   :  { %v151_v24 = vsel %vm150_vm0, %v207_v20, 0.0 }
  0x42   :  { %v153_v26 = vadd.f32 %v151_v24, %v134_v21  ;;  %v137_v27 = vadd.f32 %v136_v23, %v117_v19  ;;  %v155_v28 = vmul.f32 %v152_v25, %v151_v24 }
  0x44   :  { %161 = vadd.xlane.f32.xlu0 %v153_v26  ;;  %v156_v30 = vadd.f32 %v155_v28, %v137_v27 }
  0x46   :  { %167 = vadd.xlane.f32.xlu1 %v156_v30 }
  0x48   :  { %164 = vadd.xlane.f32.xlu0 %v154_v29 }
  0xd1   :  { %v162_v31 = vpop.xlane.xlu0 %161 }
  0xd2   :  { %v169_v32 = vadd.f32 1e-06, %v162_v31 }
  0xd3   :  { %v168_v35 = vpop.xlane.xlu1 %167 }
  0xd4   :  { %208 = vrcp.f32 %v169_v32 }
  0xd5   :  { %v165_v33 = vpop.xlane.xlu0 %164 }
  0xd6   :  { %v174_v34 = vadd.f32 1e-06, %v165_v33 }
  0xd8   :  { %210 = vrcp.f32 %v174_v34 }
  0xde   :  { %v209_v36 = vpop.eup %208 }
  0xdf   :  { %v171_v37 = vmul.f32 %v209_v36, %v168_v35 }
  0xe1   :  { %173 = vst.msk [vmem:[%s314_s2] sm:$0xff] %vm172_vm1, %v171_v37 }
  0xe2   :  { %v211_v38 = vpop.eup %210 }
  0xe3   :  { %v176_v39 = vmul.f32 %v211_v38, %v168_v35 }
  0xe5   :  { %177 = vst.msk [vmem:[%s315_s3] sm:$0xff] %vm172_vm1, %v176_v39 }
  0xe6   :  { %186 = vsyncpa [#allocation6], 1 }
  0xe7   :  { %187 = vsyncpa [#allocation8], 1 }

</bundles_post_ra>
